<compile_context>
chip_gen: v6e
topology: v6e:2x2x1
jax: 0.10.0
libtpu: 0.0.40
codegen_flags: <defaults>
</compile_context>

<pallas_src>
import functools

import jax
import jax.numpy as jnp
from jax import lax
from jax.experimental import pallas as pl
from jax.experimental.pallas import tpu as pltpu


def _round_up(x, m):
    return (x + m - 1) // m * m


def _linear_kernel(x_ref, w_ref, b_ref, o_ref, acc_ref, *, compute_dtype, k_size, tk):
    # x_ref:   (tm, tk)  activation tile
    # w_ref:   (tn, tk)  weight tile, PyTorch layout [N, K]
    # b_ref:   (1,  tn)  bias tile (f32)
    # o_ref:   (tm, tn)  output tile
    # acc_ref: (tm, tn)  f32 accumulator (scratch, persists across K steps)
    k = pl.program_id(2)

    @pl.when(k == 0)
    def _():
        # Seed the accumulator with the bias -> no extra add/broadcast at flush.
        acc_ref[...] = jnp.broadcast_to(b_ref[...], acc_ref.shape)

    x = x_ref[...]
    w = w_ref[...]
    if x.dtype != compute_dtype:
        x = x.astype(compute_dtype)
    if w.dtype != compute_dtype:
        w = w.astype(compute_dtype)

    if k_size % tk != 0:
        # Last K block is ragged: zero the out-of-range K columns so garbage
        # (possibly NaN) VMEM padding cannot contaminate valid outputs.
        col = lax.broadcasted_iota(jnp.int32, (1, tk), 1) + k * tk
        valid = col < k_size
        x = jnp.where(valid, x, jnp.zeros_like(x))
        w = jnp.where(valid, w, jnp.zeros_like(w))

    # Contract the shared K axis of x (tm, tk) and W (tn, tk) -> (tm, tn).
    acc_ref[...] += lax.dot_general(
        x, w,
        dimension_numbers=(((1,), (1,)), ((), ())),
        preferred_element_type=jnp.float32,
    )

    @pl.when(k == pl.num_programs(2) - 1)
    def _():
        o_ref[...] = acc_ref[...].astype(o_ref.dtype)


def linear_connector_forward(
    x, weight, bias, *,
    tm=512, tn=256, tk=2048,
    compute_dtype=jnp.bfloat16,
    weight_buffer_count=2,
):
    """y = x @ weight.T + bias (torch.nn.Linear semantics).

    x:      (..., K)  K = output_size (in_features)
    weight: (N, K)    N = input_size  (out_features), ideally pre-cast to bf16
    bias:   (N,)
    compute_dtype: MXU operand dtype (default bf16); accumulation stays f32.
    returns (..., N) in x.dtype.
    """
    orig_shape = x.shape
    K = orig_shape[-1]
    N = weight.shape[0]
    assert weight.shape == (N, K)

    out_dtype = x.dtype
    x2d = x.reshape(-1, K)          # free reshape of contiguous leading dims
    M = x2d.shape[0]

    if compute_dtype is None:
        compute_dtype = jnp.promote_types(x.dtype, weight.dtype)
    compute_dtype = jnp.dtype(compute_dtype)

    # Bias stays f32 (tiny array; cast cost negligible).
    b2d = bias.astype(jnp.float32).reshape(1, N)

    # --- tile sizing -------------------------------------------------------
    sublane = {4: 8, 2: 16, 1: 32}[compute_dtype.itemsize]
    tm = min(tm, _round_up(M, sublane))

    # Lane (N) tile: full extent when tiny, else 256-aligned (v6e/v7x MXU).
    if N <= 128:
        tn = N
    else:
        tn = min(tn, _round_up(N, 256))

    # K tile: full K when it fits a single step, else 256-aligned tiling
    # (ragged last block masked in-kernel).
    if K <= tk:
        tk = K
    else:
        tk = _round_up(tk, 256)

    # Guarantee >=2 blocks along a parallel axis so a 2-TC chip (v7x) can
    # shard the grid; harmless on single-TC chips.
    if pl.cdiv(M, tm) * pl.cdiv(N, tn) < 2 and N >= 256:
        tn = max(128, _round_up(pl.cdiv(N, 2), 128))

    # --- VMEM budget (per-generation cap) ----------------------------------
    x_item = jnp.dtype(x2d.dtype).itemsize
    w_item = jnp.dtype(weight.dtype).itemsize
    o_item = jnp.dtype(out_dtype).itemsize

    def _tile_bytes(tm_, tn_, tk_):
        return (2 * tm_ * tk_ * x_item        # x tiles (double-buffered)
                + 2 * tn_ * tk_ * w_item      # W tiles
                + 2 * tn_ * 4                 # bias tiles
                + 2 * tm_ * tn_ * o_item      # output tiles
                + tm_ * tn_ * 4)              # f32 accumulator

    try:
        vmem_cap = int(pltpu.get_tpu_info().vmem_capacity_bytes)
        if vmem_cap <= 0:
            raise ValueError
    except Exception:
        vmem_cap = 64 << 20   # conservative: v7x per-TC physical VMEM

    budget = int(0.80 * vmem_cap)
    while _tile_bytes(tm, tn, tk) > budget:
        if tk > 512:
            tk = max(512, _round_up(tk // 2, 256))
        elif tm > 2 * sublane:
            tm = max(sublane, _round_up(tm // 2, sublane))
        elif tn > 128:
            tn = max(128, _round_up(tn // 2, 128))
        else:
            break

    vmem_limit = int(min(max(int(1.3 * _tile_bytes(tm, tn, tk)), 32 << 20),
                         int(0.85 * vmem_cap)))

    grid = (pl.cdiv(M, tm), pl.cdiv(N, tn), pl.cdiv(K, tk))

    cost = pl.CostEstimate(
        flops=2 * M * N * K,
        transcendentals=0,
        bytes_accessed=(x2d.size * x_item + weight.size * w_item
                        + b2d.size * 4 + M * N * o_item),
    )

    kernel = functools.partial(
        _linear_kernel, compute_dtype=compute_dtype, k_size=K, tk=tk)

    # Optional deeper buffering of the weight stream (v5e weight-BW-bound).
    w_spec_kwargs = {}
    if weight_buffer_count and weight_buffer_count > 2:
        w_spec_kwargs["pipeline_mode"] = pl.Buffered(weight_buffer_count)

    out = pl.pallas_call(
        kernel,
        out_shape=jax.ShapeDtypeStruct((M, N), out_dtype),
        grid_spec=pltpu.PrefetchScalarGridSpec(
            num_scalar_prefetch=0,
            grid=grid,
            in_specs=[
                pl.BlockSpec((tm, tk), lambda i, j, k: (i, k)),   # x tile
                pl.BlockSpec((tn, tk), lambda i, j, k: (j, k),    # W tile [N,K]
                             **w_spec_kwargs),
                pl.BlockSpec((1, tn), lambda i, j, k: (0, j)),    # bias tile
            ],
            out_specs=pl.BlockSpec((tm, tn), lambda i, j, k: (i, j)),
            scratch_shapes=[pltpu.VMEM((tm, tn), jnp.float32)],
        ),
        compiler_params=pltpu.CompilerParams(
            dimension_semantics=("parallel", "parallel", "arbitrary"),
            vmem_limit_bytes=vmem_limit,
        ),
        cost_estimate=cost,
    )(x2d, weight, b2d)

    return out.reshape(*orig_shape[:-1], N)


if __name__ == "__main__":
    # LinearConnector(output_size, input_size) wraps
    # nn.Linear(in_features=output_size, out_features=input_size).
    output_size = 32   # K
    input_size = 64    # N
    batch, seq = 2, 8

    key = jax.random.PRNGKey(0)
    kx, kw, kb = jax.random.split(key, 3)

    x = jax.random.normal(kx, (batch, seq, output_size), dtype=jnp.float32)
    # Deterministic parameter init (stand-in for init_linear): scaled normal.
    weight = jax.random.normal(kw, (input_size, output_size), dtype=jnp.float32) * 0.02
    bias = jax.random.normal(kb, (input_size,), dtype=jnp.float32) * 0.02

    # Parameter prep (done once, not per forward): bf16 weights halve HBM
    # traffic and hit the bf16-native MXU path on all generations.
    weight_bf16 = weight.astype(jnp.bfloat16)

    y = linear_connector_forward(x, weight_bf16, bias)
    y = jax.block_until_ready(y)

    # Reference with the same bf16 operand rounding (f32 accumulation + bias).
    x_bf = x.astype(jnp.bfloat16).astype(jnp.float32)
    w_bf = weight_bf16.astype(jnp.float32)
    y_ref = x_bf @ w_bf.T + bias

    assert y.shape == (batch, seq, input_size)
    assert jnp.allclose(y, y_ref, atol=1e-3, rtol=1e-3), float(
        jnp.max(jnp.abs(y - y_ref)))

    print("KERNEL_OK")
</pallas_src>

<mosaic_0001>
module attributes {stable_mosaic.version = 11 : i64} {
  func.func @_linear_kernel(%arg0: i32, %arg1: i32, %arg2: i32, %arg3: memref<16x32xf32, #tpu.memory_space<vmem>>, %arg4: memref<64x32xbf16, #tpu.memory_space<vmem>>, %arg5: memref<1x64xf32, #tpu.memory_space<vmem>>, %arg6: memref<16x64xf32, #tpu.memory_space<vmem>>, %arg7: memref<16x64xf32, #tpu.memory_space<vmem>>) attributes {dimension_semantics = [#tpu.dimension_semantics<parallel>, #tpu.dimension_semantics<parallel>, #tpu.dimension_semantics<arbitrary>], iteration_bounds = array<i64: 1, 1, 1>, scalar_prefetch = 0 : i64, scratch_operands = 1 : i64, tpu.core_type = #tpu.core_type<tc>, window_params = [{transform_indices = @transform_0, window_bounds = array<i64: 16, 32>}, {transform_indices = @transform_1, window_bounds = array<i64: 64, 32>}, {transform_indices = @transform_2, window_bounds = array<i64: 1, 64>}, {transform_indices = @transform_3, window_bounds = array<i64: 16, 64>}]} {
    %c0_i32 = arith.constant 0 : i32
    %0 = arith.cmpi eq, %arg2, %c0_i32 : i32
    %1 = arith.extui %0 : i1 to i32
    %c0_i32_0 = arith.constant 0 : i32
    %2 = arith.cmpi ne, %1, %c0_i32_0 : i32
    scf.if %2 {
      %c0_10 = arith.constant 0 : index
      %c0_11 = arith.constant 0 : index
      %13 = vector.load %arg5[%c0_10, %c0_11] : memref<1x64xf32, #tpu.memory_space<vmem>>, vector<1x64xf32>
      %14 = vector.shape_cast %13 : vector<1x64xf32> to vector<1x64xf32>
      %15 = vector.broadcast %14 : vector<1x64xf32> to vector<16x64xf32>
      %c0_12 = arith.constant 0 : index
      %c0_13 = arith.constant 0 : index
      %16 = vector.load %arg7[%c0_12, %c0_13] : memref<16x64xf32, #tpu.memory_space<vmem>>, vector<16x64xf32>
      tpu.vector_store %arg7[%c0_12, %c0_13], %15 {strides = array<i32>} : memref<16x64xf32, #tpu.memory_space<vmem>>, vector<16x64xf32>,
    } else {
    }
    %c0 = arith.constant 0 : index
    %c0_1 = arith.constant 0 : index
    %3 = vector.load %arg3[%c0, %c0_1] : memref<16x32xf32, #tpu.memory_space<vmem>>, vector<16x32xf32>
    %c0_2 = arith.constant 0 : index
    %c0_3 = arith.constant 0 : index
    %4 = vector.load %arg4[%c0_2, %c0_3] : memref<64x32xbf16, #tpu.memory_space<vmem>>, vector<64x32xbf16>
    %5 = arith.truncf %3 : vector<16x32xf32> to vector<16x32xbf16>
    %c0_4 = arith.constant 0 : index
    %c0_5 = arith.constant 0 : index
    %6 = vector.load %arg7[%c0_4, %c0_5] : memref<16x64xf32, #tpu.memory_space<vmem>>, vector<16x64xf32>
    %cst = arith.constant dense<0.000000e+00> : vector<16x64xf32>
    %7 = tpu.matmul %5, %4, %cst {dimension_numbers = #tpu.dot_dimension_numbers<[1], [1], [0], [0], [0, 0, 1, 0], [], []>} : vector<16x32xbf16>, vector<64x32xbf16>, vector<16x64xf32> -> vector<16x64xf32>
    %8 = arith.addf %6, %7 : vector<16x64xf32>
    %c0_6 = arith.constant 0 : index
    %c0_7 = arith.constant 0 : index
    %9 = vector.load %arg7[%c0_6, %c0_7] : memref<16x64xf32, #tpu.memory_space<vmem>>, vector<16x64xf32>
    tpu.vector_store %arg7[%c0_6, %c0_7], %8 {strides = array<i32>} : memref<16x64xf32, #tpu.memory_space<vmem>>, vector<16x64xf32>,
    %c0_i32_8 = arith.constant 0 : i32
    %10 = arith.cmpi eq, %arg2, %c0_i32_8 : i32
    %11 = arith.extui %10 : i1 to i32
    %c0_i32_9 = arith.constant 0 : i32
    %12 = arith.cmpi ne, %11, %c0_i32_9 : i32
    scf.if %12 {
      %c0_10 = arith.constant 0 : index
      %c0_11 = arith.constant 0 : index
      %13 = vector.load %arg7[%c0_10, %c0_11] : memref<16x64xf32, #tpu.memory_space<vmem>>, vector<16x64xf32>
      %c0_12 = arith.constant 0 : index
      %c0_13 = arith.constant 0 : index
      %14 = vector.load %arg6[%c0_12, %c0_13] : memref<16x64xf32, #tpu.memory_space<vmem>>, vector<16x64xf32>
      tpu.vector_store %arg6[%c0_12, %c0_13], %13 {strides = array<i32>} : memref<16x64xf32, #tpu.memory_space<vmem>>, vector<16x64xf32>,
    } else {
    }
    return
  }
  func.func @transform_0(%arg0: i32, %arg1: i32, %arg2: i32) -> (i32, i32) {
    %c0_i32 = arith.constant 0 : i32
    return %arg0, %arg2 : i32, i32
  }
  func.func @transform_1(%arg0: i32, %arg1: i32, %arg2: i32) -> (i32, i32) {
    %c0_i32 = arith.constant 0 : i32
    return %arg1, %arg2 : i32, i32
  }
  func.func @transform_2(%arg0: i32, %arg1: i32, %arg2: i32) -> (i32, i32) {
    %c0_i32 = arith.constant 0 : i32
    %c0_i32_0 = arith.constant 0 : i32
    return %c0_i32, %arg1 : i32, i32
  }
  func.func @transform_3(%arg0: i32, %arg1: i32, %arg2: i32) -> (i32, i32) {
    %c0_i32 = arith.constant 0 : i32
    return %arg0, %arg1 : i32, i32
  }
}

</mosaic_0001>

<bundles_post_ra>
// kernel: tpu_custom_call.1
= control target key start
LH: loop header
LB: loop body
LE: loop exit
PB: predicated region body
PF: predicated region fallthrough
CT: control target
= control target key end

     0   :  { %v202_v1 = vmov 0.0   ;;  %vm63_vm0 = vcmask 261120   ;;  %vm203_vm1 = vmmov 0   ;;  %vm27_vm2 = vcmask 523264   ;;  %s262_s0 = inlined_call_operand.vmem [shape: f32[16,32], index: 0, kind: input, shape index: {}]   ;;  %s263_s1 = inlined_call_operand.vmem [shape: bf16[64,32], index: 1, kind: input, shape index: {}]   ;;  %s264_s2 = inlined_call_operand.vmem [shape: f32[1,64], index: 2, kind: input, shape index: {}]   ;;  %s265_s3 = inlined_call_operand.hbm [shape: f32[16,64], index: 3, kind: output, shape index: {}]  }
   0x1   :  { %v176_v0 = vld [vmem:[%s263_s1 + $0x18] sm:$0xff]   ;;  %159 = vmatprep.subr.bf16.mxu0 %v202_v1  ;;  %v177_v3 = vld [vmem:[%s263_s1 + $0x10] sm:$0xff]   ;;  %v148_v4 = vld [vmem:[%s264_s2] ss:$0 sm:$0xff]  ;;  %167 = vmatprep.mubr.msk.bf16.mxu0 %vm203_vm1, %v202_v1 }
   0x2   :  { %v77_v2 = vsel %vm63_vm0, %v176_v0, 0 }
   0x3   :  { %160 = vmatpush3.bf16.xpose.msra.mxu0 %v77_v2 }
   0x4   :  { %161 = vmatprep.subr.bf16.mxu0 %v202_v1 }
   0x5   :  { %8 = vsyncpa [#allocation4], 0  ;;  %28 = vst.msk [vmem:[#allocation2] sm:$0xff] %vm27_vm2, %v148_v4  ;;  %v74_v5 = vsel %vm63_vm0, %v177_v3, 0  ;;  %v178_v6 = vld [vmem:[%s263_s1 + $0x8] sm:$0xff]   ;;  %v179_v8 = vld [vmem:[%s263_s1] sm:$0xff]  }
   0x6   :  { %29 = vst.msk [vmem:[#allocation2 + $0x8] sm:$0xff] %vm27_vm2, %v148_v4  ;;  %v71_v7 = vsel %vm63_vm0, %v178_v6, 0  ;;  %v68_v9 = vsel %vm63_vm0, %v179_v8, 0  ;;  %v30_v10 = vld [vmem:[%s262_s0] sm:$0xff]  ;;  %v31_v11 = vld [vmem:[%s262_s0 + $0x8] sm:$0xff]  ;;  %s204_s1 = smov [#allocation3]  }
   0x7   :  { %v40_v12 = vpack.c.bf16 %v31_v11, %v30_v10  ;;  %s137_s25 = sshll.u32 %s204_s1, 4  ;;  %s138_s25 = int_to_ptr.vmem [resolvable:$true] %s137_s25 }
   0x8   :  { %s180_s0 = scalar_lea.vmem %s138_s25, 256  ;;  %p185_p1 = scmp.lt.s32.totalorder %s138_s25, %s138_s25 }
   0x9   :  { %p181_p0 = scmp.ne.s32.totalorder %s138_s25, %s180_s0  ;;  %p186_p2 = scmp.lt.s32.totalorder %s180_s0, %s180_s0 }
   0xb   :  { %162 = vmatpush3.bf16.xpose.msra.mxu0 %v74_v5  ;;  %p187_p3 = por %p186_p2, %p185_p1 }
   0xc   :  { %163 = vmatprep.subr.bf16.mxu0 %v202_v1  ;;  %v41_v13 = vld [vmem:[#allocation2] sm:$0xff] }
   0xd   :  { %v42_v17 = vld [vmem:[#allocation2 + $0x8] sm:$0xff]  ;;  %p188_p4 = pnand %p187_p3, %p181_p0 }
  0x13   :  { %164 = vmatpush3.bf16.xpose.msra.mxu0 %v71_v7 }
  0x14   :  { %165 = vmatprep.subr.bf16.mxu0 %v202_v1 }
  0x1b   :  { %166 = vmatpush3.bf16.xpose.msra.mxu0 %v68_v9 }
  0x22   :  { %168 = vmatmul.mubr.msk.bf16.vlgmr.msra.gmra.mxu0 %vm63_vm0, %v40_v12 }
  0xe2   :  { %v113_v14 = vpop.f32.mrf.mxu0 }
  0xe3   :  { %v120_v15 = vadd.f32 %v113_v14, %v41_v13 }
  0xe4   :  { %v169_v16 = vpop.f32.mrf.mxu0 }
  0xe5   :  { %123 = vst.msk [vmem:[#allocation2] sm:$0xff] %vm27_vm2, %v120_v15 }
  0xe6   :  { %v116_v18 = vpop.f32.mrf.mxu0 }
  0xe7   :  { %v121_v19 = vadd.f32 %v116_v18, %v42_v17 }
  0xe8   :  { %v170_v20 = vpop.f32.mrf.mxu0 }
  0xe9   :  { %124 = vst.msk [vmem:[#allocation2 + $0x8] sm:$0xff] %vm27_vm2, %v121_v19 }
  0xec   :  { %v128_v21 = vld [vmem:[#allocation2] sm:$0xff] }
  0xed   :  { %130 = vst.msk [vmem:[#allocation3] sm:$0xff] %vm27_vm2, %v128_v21 }
  0xf0   :  { %v129_v22 = vld [vmem:[#allocation2 + $0x8] sm:$0xff] }
  0xf1   :  { %131 = vst.msk [vmem:[#allocation3 + $0x8] sm:$0xff] %vm27_vm2, %v129_v22 }
  0xf2   :  { %191 = shalt.err (!%p188_p4)
}
  0xf3   :  { %s205_s26 = smov 128   ;;  %s206_s27 = smov 8  }
  0xf4   :  { %143 = dma.vmem_to_hbm [thread:$0]  %s138_s25, 256, %s265_s3, [#allocation4], %s205_s26, %s205_s26, %s206_s27  }
  0xf5   :  { %200 = dma.done.wait [#allocation4], 256  }
  0xf6   :  { %201 = vsyncadd [#allocation4], 4294967040 }
  0xf7   :  { %147 = vsyncpa [#allocation4], 1 }

</bundles_post_ra>
